<compile_context>
chip_gen: v5e
topology: v5e:2x2
jax: 0.10.0
libtpu: 0.0.40
codegen_flags: <defaults>
</compile_context>

<pallas_src>
import math
from functools import partial

import jax
import jax.numpy as jnp
from jax.experimental import pallas as pl
from jax.experimental.pallas import tpu as pltpu


def _pair(x):
    if isinstance(x, (tuple, list)):
        return tuple(x)
    return (x, x)


def _conv2d(x, w, b, stride, padding, dilation):
    """Plain Conv2d (NCHW) used for the packed offset / mask branches."""
    out = jax.lax.conv_general_dilated(
        x, w,
        window_strides=stride,
        padding=[(padding[0], padding[0]), (padding[1], padding[1])],
        rhs_dilation=dilation,
        dimension_numbers=("NCHW", "OIHW", "NCHW"))
    return out + b[None, :, None, None]


def _pick_tn(ck, c_out, n):
    """Lane tile over output positions: multiple of 128, 256-aligned, <=512,
    sized so double-buffered blocks stay well inside VMEM on every TPU gen."""
    n128 = -(-n // 128) * 128
    # per-lane bytes: corners (bf16, double-buffered) + out (f32, double-
    # buffered) + in-kernel f32 col temporary.
    per_lane = 4 * ck * 2 * 2 + c_out * 4 * 2 + ck * 4
    budget = 12 * 1024 * 1024          # conservative for v7x's 64 MiB VMEM
    tn = max(128, (budget // max(per_lane, 1)) // 128 * 128)
    if tn > 256:
        tn -= tn % 256                 # 256-aligned tiles feed the 256-wide MXU
    tn = min(tn, 512, n128)
    return int(max(tn, 128))


def _build_weighted_corners(x, offset, mask, kh, kw, stride, padding, dilation, og):
    """Gather the 4 bilinear corner samples and pre-multiply them by the
    bilinear weights, validity mask and modulation mask.

    Returns (B, 4, C_in*K, N) float32.
    """
    sh, sw = stride
    ph, pw = padding
    dh, dw = dilation
    B, C_in, H, W = x.shape
    K = kh * kw
    Ho, Wo = offset.shape[2], offset.shape[3]
    N = Ho * Wo
    Cg = C_in // og

    off = offset.reshape(B, og, K, 2, N)            # comp 0 = h, comp 1 = w
    msk = mask.reshape(B, og, K, N)

    ki, kj = jnp.meshgrid(jnp.arange(kh), jnp.arange(kw), indexing="ij")
    ki = ki.reshape(K).astype(jnp.float32)
    kj = kj.reshape(K).astype(jnp.float32)
    oy, ox = jnp.meshgrid(jnp.arange(Ho), jnp.arange(Wo), indexing="ij")
    oy = oy.reshape(N).astype(jnp.float32)
    ox = ox.reshape(N).astype(jnp.float32)

    base_h = oy[None, :] * sh - ph + ki[:, None] * dh    # (K, N)
    base_w = ox[None, :] * sw - pw + kj[:, None] * dw

    h = base_h[None, None] + off[:, :, :, 0]             # (B, og, K, N)
    w_ = base_w[None, None] + off[:, :, :, 1]

    h0f = jnp.floor(h)
    w0f = jnp.floor(w_)
    fh = h - h0f
    fw = w_ - w0f
    h0 = h0f.astype(jnp.int32)
    w0 = w0f.astype(jnp.int32)

    x_r = x.reshape(B, og, Cg, H * W)
    CK = C_in * K

    corners = []
    for ch in (0, 1):
        for cw in (0, 1):
            hi = h0 + ch
            wi = w0 + cw
            valid = (hi >= 0) & (hi < H) & (wi >= 0) & (wi < W)
            bwgt = (fh if ch else 1.0 - fh) * (fw if cw else 1.0 - fw)
            bwgt = bwgt * valid.astype(jnp.float32) * msk         # (B, og, K, N)
            flat = jnp.clip(hi, 0, H - 1) * W + jnp.clip(wi, 0, W - 1)
            # Broadcast the (small int32) index across channels — NOT the
            # source tensor — so XLA does not materialize 4 copies of x.
            idx = jnp.broadcast_to(flat.reshape(B, og, 1, K * N),
                                   (B, og, Cg, K * N))
            g = jnp.take_along_axis(x_r, idx, axis=-1)            # (B, og, Cg, K*N)
            g = g.reshape(B, og, Cg, K, N) * bwgt[:, :, None]
            corners.append(g.reshape(B, CK, N))
    return jnp.stack(corners, axis=1)                             # (B, 4, CK, N)


def _dcn2d_kernel(corners_ref, w_ref, b_ref, out_ref, *, groups):
    # corners_ref : (1, 4, G, CKg, tn) bf16  pre-weighted corner samples
    # w_ref       : (G, co_g, CKg)     bf16  flattened per-group weights
    # b_ref       : (G, co_g, 1)       f32
    # out_ref     : (1, G, co_g, tn)   f32
    for g in range(groups):
        # 4-corner combine (f32 on the VPU) fused right before this group's dot.
        col = corners_ref[0, 0, g].astype(jnp.float32)
        for c in range(1, 4):
            col = col + corners_ref[0, c, g].astype(jnp.float32)
        acc = jnp.dot(w_ref[g], col.astype(jnp.bfloat16),
                      preferred_element_type=jnp.float32)
        out_ref[0, g] = (acc + b_ref[g]).astype(out_ref.dtype)


def deform_conv2d(input, weight, offset, mask=None, bias=None,
                  stride=(1, 1), padding=(0, 0), dilation=(1, 1)):
    """Forward pass matching tvdcn.deform_conv2d semantics (NCHW)."""
    x = jnp.asarray(input, jnp.float32)
    weight = jnp.asarray(weight, jnp.float32)
    offset = jnp.asarray(offset, jnp.float32)
    stride = _pair(stride)
    padding = _pair(padding)
    dilation = _pair(dilation)

    B, C_in, H, W = x.shape
    C_out, Ci_g, kh, kw = weight.shape
    groups = C_in // Ci_g
    K = kh * kw
    og = offset.shape[1] // (2 * K)
    if og == 0 or offset.shape[1] % (2 * K) != 0:
        raise RuntimeError("offset channel dim must be a multiple of 2*kh*kw")
    assert C_in % og == 0, "in_channels must be divisible by offset groups"
    Ho, Wo = offset.shape[2], offset.shape[3]
    N = Ho * Wo

    if bias is None:
        bias = jnp.zeros((C_out,), jnp.float32)
    if mask is None:
        mask = jnp.ones((B, og * K, Ho, Wo), jnp.float32)
    mask = jnp.asarray(mask, jnp.float32)

    # ------------- glue: gather + fold bilinear weights & mask ---------------
    corners = _build_weighted_corners(x, offset, mask, kh, kw,
                                      stride, padding, dilation, og)
    CK = C_in * K
    CKg = Ci_g * K
    co_g = C_out // groups

    corners_bf = corners.reshape(B, 4, groups, CKg, N).astype(jnp.bfloat16)

    tn = _pick_tn(CK, C_out, N)
    Np = -(-N // tn) * tn
    if Np != N:
        corners_bf = jnp.pad(corners_bf,
                             ((0, 0), (0, 0), (0, 0), (0, 0), (0, Np - N)))
    nt = Np // tn

    w_g = weight.reshape(groups, co_g, CKg).astype(jnp.bfloat16)
    b_g = jnp.asarray(bias, jnp.float32).reshape(groups, co_g, 1)

    # ----------------------------- Pallas kernel -----------------------------
    kernel = partial(_dcn2d_kernel, groups=groups)
    out = pl.pallas_call(
        kernel,
        out_shape=jax.ShapeDtypeStruct((B, groups, co_g, Np), jnp.float32),
        grid=(B, nt),
        in_specs=[
            pl.BlockSpec((1, 4, groups, CKg, tn), lambda b, j: (b, 0, 0, 0, j)),
            pl.BlockSpec((groups, co_g, CKg), lambda b, j: (0, 0, 0)),
            pl.BlockSpec((groups, co_g, 1), lambda b, j: (0, 0, 0)),
        ],
        out_specs=pl.BlockSpec((1, groups, co_g, tn), lambda b, j: (b, 0, 0, j)),
        compiler_params=pltpu.CompilerParams(
            dimension_semantics=("parallel", "parallel"),
            vmem_limit_bytes=48 * 1024 * 1024),
    )(corners_bf, w_g, b_g)

    # keep the [:N] slice: bias lands on padded lanes, sliced off here.
    return out.reshape(B, C_out, Np)[:, :, :N].reshape(B, C_out, Ho, Wo)


def deform_conv2d_reference(x, weight, offset, mask, bias,
                            stride=(1, 1), padding=(0, 0), dilation=(1, 1)):
    """Pure-JAX f32 reference (no Pallas, no bf16) for correctness checks."""
    x = jnp.asarray(x, jnp.float32)
    weight = jnp.asarray(weight, jnp.float32)
    offset = jnp.asarray(offset, jnp.float32)
    stride = _pair(stride)
    padding = _pair(padding)
    dilation = _pair(dilation)
    B, C_in, H, W = x.shape
    C_out, Ci_g, kh, kw = weight.shape
    groups = C_in // Ci_g
    K = kh * kw
    og = offset.shape[1] // (2 * K)
    Ho, Wo = offset.shape[2], offset.shape[3]
    N = Ho * Wo
    if mask is None:
        mask = jnp.ones((B, og * K, Ho, Wo), jnp.float32)
    if bias is None:
        bias = jnp.zeros((C_out,), jnp.float32)
    corners = _build_weighted_corners(x, offset, jnp.asarray(mask, jnp.float32),
                                      kh, kw, stride, padding, dilation, og)
    col = corners.sum(axis=1).reshape(B, groups, Ci_g * K, N)
    w = weight.reshape(groups, C_out // groups, Ci_g * K)
    out = jnp.einsum("gok,bgkn->bgon", w, col).reshape(B, C_out, N)
    out = out + jnp.asarray(bias, jnp.float32).reshape(1, C_out, 1)
    return out.reshape(B, C_out, Ho, Wo)


class DeformConv2d:
    """JAX port of tvdcn.DeformConv2d (forward only)."""

    def __init__(self, in_channels, out_channels, kernel_size, stride=1,
                 padding=0, dilation=1, groups=1, bias=True,
                 key=jax.random.PRNGKey(0)):
        assert in_channels % groups == 0 and out_channels % groups == 0
        self.in_channels = in_channels
        self.out_channels = out_channels
        self.kernel_size = _pair(kernel_size)
        self.stride = _pair(stride)
        self.padding = _pair(padding)
        self.dilation = _pair(dilation)
        self.groups = groups
        kh, kw = self.kernel_size
        fan_in = (in_channels // groups) * kh * kw
        bound = 1.0 / math.sqrt(fan_in)   # kaiming_uniform(a=sqrt(5)) bound
        kw_, kb_ = jax.random.split(key)
        self.weight = jax.random.uniform(
            kw_, (out_channels, in_channels // groups, kh, kw),
            jnp.float32, -bound, bound)
        self.bias = (jax.random.uniform(kb_, (out_channels,), jnp.float32,
                                        -bound, bound) if bias else None)

    def __call__(self, x, offset, mask=None):
        return deform_conv2d(x, self.weight, offset, mask, self.bias,
                             stride=self.stride, padding=self.padding,
                             dilation=self.dilation)


class PackedDeformConv2d(DeformConv2d):
    """JAX port of tvdcn.PackedDeformConv2d (forward only)."""

    def __init__(self, in_channels, out_channels, kernel_size, stride=1,
                 padding=0, dilation=1, groups=1, bias=True, modulated=False,
                 key=jax.random.PRNGKey(0)):
        super().__init__(in_channels, out_channels, kernel_size, stride,
                         padding, dilation, groups, bias, key=key)
        self.modulated = modulated
        kh, kw = self.kernel_size
        K = kh * kw
        # reference reset_parameters zero-initializes both packed convs.
        self.conv_offset_w = jnp.zeros((2 * K, in_channels, kh, kw), jnp.float32)
        self.conv_offset_b = jnp.zeros((2 * K,), jnp.float32)
        if modulated:
            self.conv_mask_w = jnp.zeros((K, in_channels, kh, kw), jnp.float32)
            self.conv_mask_b = jnp.zeros((K,), jnp.float32)
        else:
            self.conv_mask_w = None
            self.conv_mask_b = None

    def _offset_mask(self, x):
        offset = _conv2d(x, self.conv_offset_w, self.conv_offset_b,
                         self.stride, self.padding, self.dilation)
        mask = None
        if self.modulated:
            mask = jax.nn.sigmoid(_conv2d(x, self.conv_mask_w, self.conv_mask_b,
                                          self.stride, self.padding,
                                          self.dilation))
        return offset, mask

    def __call__(self, x):
        offset, mask = self._offset_mask(x)
        return deform_conv2d(x, self.weight, offset, mask, self.bias,
                             stride=self.stride, padding=self.padding,
                             dilation=self.dilation)


if __name__ == "__main__":
    key = jax.random.PRNGKey(0)
    ks = jax.random.split(key, 10)

    # ---- PackedDeformConv2d (modulated), groups=1 ---------------------------
    B, C_in, C_out, H, W = 2, 4, 8, 16, 16
    conv = PackedDeformConv2d(C_in, C_out, kernel_size=3, stride=1, padding=1,
                              dilation=1, groups=1, bias=True, modulated=True,
                              key=ks[0])
    # The reference zero-initializes conv_offset/conv_mask (degenerate offsets);
    # give them small random values here purely to exercise the deformable path.
    conv.conv_offset_w = 0.1 * jax.random.normal(ks[1], conv.conv_offset_w.shape)
    conv.conv_offset_b = 0.1 * jax.random.normal(ks[2], conv.conv_offset_b.shape)
    conv.conv_mask_w = 0.1 * jax.random.normal(ks[3], conv.conv_mask_w.shape)
    conv.conv_mask_b = 0.1 * jax.random.normal(ks[4], conv.conv_mask_b.shape)

    x = jax.random.normal(ks[5], (B, C_in, H, W), jnp.float32)
    out = jax.jit(conv.__call__)(x)
    jax.block_until_ready(out)
    assert out.shape == (B, C_out, H, W), out.shape
    assert bool(jnp.all(jnp.isfinite(out)))

    offset, mask = conv._offset_mask(x)
    ref = deform_conv2d_reference(x, conv.weight, offset, mask, conv.bias,
                                  conv.stride, conv.padding, conv.dilation)
    err = float(jnp.max(jnp.abs(out - ref)))
    assert err < 5e-2, f"packed modulated mismatch: {err}"

    # ---- grouped DeformConv2d with 2 offset groups --------------------------
    g_conv = DeformConv2d(C_in, C_out, kernel_size=3, stride=1, padding=1,
                          dilation=1, groups=2, bias=True, key=ks[6])
    og, K = 2, 9
    offset2 = 0.7 * jax.random.normal(ks[7], (B, 2 * og * K, H, W), jnp.float32)
    mask2 = jax.nn.sigmoid(jax.random.normal(ks[8], (B, og * K, H, W),
                                             jnp.float32))
    out2 = g_conv(x, offset2, mask2)
    jax.block_until_ready(out2)
    assert out2.shape == (B, C_out, H, W), out2.shape
    ref2 = deform_conv2d_reference(x, g_conv.weight, offset2, mask2, g_conv.bias,
                                   g_conv.stride, g_conv.padding,
                                   g_conv.dilation)
    err2 = float(jnp.max(jnp.abs(out2 - ref2)))
    assert err2 < 5e-2, f"grouped mismatch: {err2}"

    print("KERNEL_OK")
</pallas_src>

<mosaic_0001>
module attributes {stable_mosaic.version = 11 : i64} {
  func.func @_dcn2d_kernel(%arg0: i32, %arg1: i32, %arg2: memref<1x4x1x36x256xbf16, #tpu.memory_space<vmem>>, %arg3: memref<1x8x36xbf16, #tpu.memory_space<vmem>>, %arg4: memref<1x8x1xf32, #tpu.memory_space<vmem>>, %arg5: memref<1x1x8x256xf32, #tpu.memory_space<vmem>>) attributes {dimension_semantics = [#tpu.dimension_semantics<parallel>, #tpu.dimension_semantics<parallel>], iteration_bounds = array<i64: 2, 1>, scalar_prefetch = 0 : i64, scratch_operands = 0 : i64, tpu.core_type = #tpu.core_type<tc>, window_params = [{transform_indices = @transform_0, window_bounds = array<i64: 1, 4, 1, 36, 256>}, {pipeline_mode = #tpu.pipeline_mode<synchronous>, transform_indices = @transform_1, window_bounds = array<i64: 1, 8, 36>}, {pipeline_mode = #tpu.pipeline_mode<synchronous>, transform_indices = @transform_2, window_bounds = array<i64: 1, 8, 1>}, {transform_indices = @transform_3, window_bounds = array<i64: 1, 1, 8, 256>}]} {
    %c0 = arith.constant 0 : index
    %c0_0 = arith.constant 0 : index
    %c0_1 = arith.constant 0 : index
    %c0_2 = arith.constant 0 : index
    %c0_3 = arith.constant 0 : index
    %0 = vector.load %arg2[%c0, %c0_0, %c0_1, %c0_2, %c0_3] : memref<1x4x1x36x256xbf16, #tpu.memory_space<vmem>>, vector<1x1x1x36x256xbf16>
    %1 = vector.shape_cast %0 : vector<1x1x1x36x256xbf16> to vector<36x256xbf16>
    %2 = arith.extf %1 : vector<36x256xbf16> to vector<36x256xf32>
    %c0_4 = arith.constant 0 : index
    %c1 = arith.constant 1 : index
    %c0_5 = arith.constant 0 : index
    %c0_6 = arith.constant 0 : index
    %c0_7 = arith.constant 0 : index
    %3 = vector.load %arg2[%c0_4, %c1, %c0_5, %c0_6, %c0_7] : memref<1x4x1x36x256xbf16, #tpu.memory_space<vmem>>, vector<1x1x1x36x256xbf16>
    %4 = vector.shape_cast %3 : vector<1x1x1x36x256xbf16> to vector<36x256xbf16>
    %5 = arith.extf %4 : vector<36x256xbf16> to vector<36x256xf32>
    %6 = arith.addf %2, %5 : vector<36x256xf32>
    %c0_8 = arith.constant 0 : index
    %c2 = arith.constant 2 : index
    %c0_9 = arith.constant 0 : index
    %c0_10 = arith.constant 0 : index
    %c0_11 = arith.constant 0 : index
    %7 = vector.load %arg2[%c0_8, %c2, %c0_9, %c0_10, %c0_11] : memref<1x4x1x36x256xbf16, #tpu.memory_space<vmem>>, vector<1x1x1x36x256xbf16>
    %8 = vector.shape_cast %7 : vector<1x1x1x36x256xbf16> to vector<36x256xbf16>
    %9 = arith.extf %8 : vector<36x256xbf16> to vector<36x256xf32>
    %10 = arith.addf %6, %9 : vector<36x256xf32>
    %c0_12 = arith.constant 0 : index
    %c3 = arith.constant 3 : index
    %c0_13 = arith.constant 0 : index
    %c0_14 = arith.constant 0 : index
    %c0_15 = arith.constant 0 : index
    %11 = vector.load %arg2[%c0_12, %c3, %c0_13, %c0_14, %c0_15] : memref<1x4x1x36x256xbf16, #tpu.memory_space<vmem>>, vector<1x1x1x36x256xbf16>
    %12 = vector.shape_cast %11 : vector<1x1x1x36x256xbf16> to vector<36x256xbf16>
    %13 = arith.extf %12 : vector<36x256xbf16> to vector<36x256xf32>
    %14 = arith.addf %10, %13 : vector<36x256xf32>
    %c0_16 = arith.constant 0 : index
    %c0_17 = arith.constant 0 : index
    %c0_18 = arith.constant 0 : index
    %15 = vector.load %arg3[%c0_16, %c0_17, %c0_18] : memref<1x8x36xbf16, #tpu.memory_space<vmem>>, vector<1x8x36xbf16>
    %16 = vector.shape_cast %15 : vector<1x8x36xbf16> to vector<8x36xbf16>
    %17 = arith.truncf %14 : vector<36x256xf32> to vector<36x256xbf16>
    %cst = arith.constant dense<0.000000e+00> : vector<8x256xf32>
    %18 = tpu.matmul %16, %17, %cst {dimension_numbers = #tpu.dot_dimension_numbers<[1], [0], [0], [1], [0, 0, 1, 1], [], []>} : vector<8x36xbf16>, vector<36x256xbf16>, vector<8x256xf32> -> vector<8x256xf32>
    %c0_19 = arith.constant 0 : index
    %c0_20 = arith.constant 0 : index
    %c0_21 = arith.constant 0 : index
    %19 = vector.load %arg4[%c0_19, %c0_20, %c0_21] : memref<1x8x1xf32, #tpu.memory_space<vmem>>, vector<1x8x1xf32>
    %20 = vector.shape_cast %19 : vector<1x8x1xf32> to vector<8x1xf32>
    %21 = vector.broadcast %20 : vector<8x1xf32> to vector<8x256xf32>
    %22 = arith.addf %18, %21 : vector<8x256xf32>
    %c0_22 = arith.constant 0 : index
    %c0_23 = arith.constant 0 : index
    %c0_24 = arith.constant 0 : index
    %c0_25 = arith.constant 0 : index
    %23 = vector.load %arg5[%c0_22, %c0_23, %c0_24, %c0_25] : memref<1x1x8x256xf32, #tpu.memory_space<vmem>>, vector<1x1x8x256xf32>
    %24 = vector.shape_cast %23 : vector<1x1x8x256xf32> to vector<8x256xf32>
    %25 = vector.shape_cast %22 : vector<8x256xf32> to vector<1x1x8x256xf32>
    tpu.vector_store %arg5[%c0_22, %c0_23, %c0_24, %c0_25], %25 {strides = array<i32>} : memref<1x1x8x256xf32, #tpu.memory_space<vmem>>, vector<1x1x8x256xf32>,
    return
  }
  func.func @transform_0(%arg0: i32, %arg1: i32) -> (i32, i32, i32, i32, i32) {
    %c0_i32 = arith.constant 0 : i32
    %c0_i32_0 = arith.constant 0 : i32
    %c0_i32_1 = arith.constant 0 : i32
    %c0_i32_2 = arith.constant 0 : i32
    return %arg0, %c0_i32, %c0_i32_0, %c0_i32_1, %arg1 : i32, i32, i32, i32, i32
  }
  func.func @transform_1(%arg0: i32, %arg1: i32) -> (i32, i32, i32) {
    %c0_i32 = arith.constant 0 : i32
    %c0_i32_0 = arith.constant 0 : i32
    %c0_i32_1 = arith.constant 0 : i32
    %c0_i32_2 = arith.constant 0 : i32
    return %c0_i32, %c0_i32_0, %c0_i32_1 : i32, i32, i32
  }
  func.func @transform_2(%arg0: i32, %arg1: i32) -> (i32, i32, i32) {
    %c0_i32 = arith.constant 0 : i32
    %c0_i32_0 = arith.constant 0 : i32
    %c0_i32_1 = arith.constant 0 : i32
    %c0_i32_2 = arith.constant 0 : i32
    return %c0_i32, %c0_i32_0, %c0_i32_1 : i32, i32, i32
  }
  func.func @transform_3(%arg0: i32, %arg1: i32) -> (i32, i32, i32, i32) {
    %c0_i32 = arith.constant 0 : i32
    %c0_i32_0 = arith.constant 0 : i32
    %c0_i32_1 = arith.constant 0 : i32
    return %arg0, %c0_i32, %c0_i32_0, %arg1 : i32, i32, i32, i32
  }
}

</mosaic_0001>

<bundles_post_ra>
// kernel: a_call__.1
= control target key start
LH: loop header
LB: loop body
LE: loop exit
PB: predicated region body
PF: predicated region fallthrough
CT: control target
= control target key end

     0   :  { %s543_s12 = smov 0   ;;  %s545_s13 = smov 0   ;;  %s610_s0 = inlined_call_operand.vmem [shape: bf16[2,4,1,36,256], index: 0, kind: input, shape index: {}]   ;;  %s611_s1 = inlined_call_operand.vmem [shape: bf16[1,8,36], index: 1, kind: input, shape index: {}]   ;;  %s612_s2 = inlined_call_operand.vmem [shape: f32[1,8,1], index: 2, kind: input, shape index: {}]   ;;  %s613_s3 = inlined_call_operand.vmem [shape: f32[2,1,8,256], index: 3, kind: output, shape index: {}]  }
   0x1   :  { %s547_s14 = smov 0  }
   0x2 LB: > { %s25_s15 = sadd.s32 1, %s516_s13  ;;  %p447_p0 = scmp.ge.s32.totalorder %s520_s14, 1  ;;  %s520_s14 = sphi %s547_s14, %s13_s14   ;;  %s516_s13 = sphi %s545_s13, %s615_s13   ;;  %s512_s12 = sphi %s543_s12, %s614_s12  }
   0x3   : > { %p27_p1 = scmp.ge.s32.totalorder %s25_s15, 2  ;;  %p158_p2 = scmp.lt.s32.totalorder %s520_s14, 3 }
   0x5   : > { %s617_s15 = smov (%p27_p1, %s25_s15), 0  ;;  %p159_p3 = pnand %p447_p0, %p158_p2 }
   0x6   : > { %p191_p4 = scmp.lt.s32.totalorder (!%p159_p3), %s512_s12, 1 }
   0x7   : > { %162 = sbr.rel (%p159_p3) target bundleno = 179 (0xb3), region = 32 }
   0xc   : > { %s619_s12 = smov (!%p191_p4, %s512_s12), 1  ;;  %v311_v0 = vld [vmem:[%s612_s2] sm:$0xff]  ;;  %v522_v1 = vmov 0   ;;  %vm321_vm0 = vcmask 1041408   ;;  %vm317_vm1 = vcmask 293888  }
   0xd   : > { %s471_s16 = smul.u32 160, %s619_s12  ;;  %497 = vset.pattern.permute.xlu0 %v522_v1  ;;  %s470_s24 = sshll.u32 %s619_s12, 4 }
   0xe   : > { %314 = vperm.xlu0 %497, %v311_v0   ;;  %s208_s27 = scalar_lea.vmem %s613_s3, %s470_s24 }
   0xf   : > { %s570_s21 = scalar_lea.vmem %s610_s0, %s471_s16 }
  0x10   : > { %v215_v2 = vld [vmem:[%s570_s21 + $0x20] sm:$0x33]  ;;  %v455_v3 = vld [vmem:[%s570_s21 + $0x48] sm:$0x33]  ;;  %v460_v4 = vld [vmem:[%s570_s21 + $0x70] sm:$0x33] }
  0x11   : > { %v224_v5 = vunpack.c.l.bf16 %v215_v2  ;;  %v240_v6 = vunpack.c.l.bf16 %v455_v3  ;;  %v266_v7 = vunpack.c.l.bf16 %v460_v4  ;;  %v465_v8 = vld [vmem:[%s570_s21 + $0x98] sm:$0x33]  ;;  %v225_v9 = vunpack.c.h.bf16 %v215_v2  ;;  %v213_v10 = vld [vmem:[%s570_s21 + $0x10] sm:$0xff]  ;;  %v454_v17 = vld [vmem:[%s570_s21 + $0x40] sm:$0xff] }
  0x12   : > { %v214_v11 = vld [vmem:[%s570_s21 + $0x18] sm:$0xff]  ;;  %v292_v12 = vunpack.c.l.bf16 %v465_v8  ;;  %v241_v13 = vunpack.c.h.bf16 %v455_v3  ;;  %v267_v14 = vunpack.c.h.bf16 %v460_v4  ;;  %v293_v15 = vunpack.c.h.bf16 %v465_v8  ;;  %v458_v18 = vld [vmem:[%s570_s21 + $0x60] sm:$0xff]  ;;  %v459_v23 = vld [vmem:[%s570_s21 + $0x68] sm:$0xff] }
  0x13   : > { %v453_v16 = vld [vmem:[%s570_s21 + $0x38] sm:$0xff]  ;;  %v250_v19 = vadd.f32 %v240_v6, %v224_v5  ;;  %v220_v20 = vunpack.c.l.bf16 %v213_v10  ;;  %v222_v21 = vunpack.c.l.bf16 %v214_v11  ;;  %v463_v24 = vld [vmem:[%s570_s21 + $0x88] sm:$0xff]  ;;  %v464_v25 = vld [vmem:[%s570_s21 + $0x90] sm:$0xff]  ;;  %v238_v27 = vunpack.c.l.bf16 %v454_v17 }
  0x14   : > { %v236_v22 = vunpack.c.l.bf16 %v453_v16  ;;  %v251_v26 = vadd.f32 %v241_v13, %v225_v9  ;;  %v262_v28 = vunpack.c.l.bf16 %v458_v18  ;;  %v264_v29 = vunpack.c.l.bf16 %v459_v23  ;;  %v211_v46 = vld [vmem:[%s570_s21] sm:$0xff]  ;;  %v212_v51 = vld [vmem:[%s570_s21 + $0x8] sm:$0xff]  ;;  %v452_v57 = vld [vmem:[%s570_s21 + $0x30] sm:$0xff] }
  0x15   : > { %v276_v30 = vadd.f32 %v266_v7, %v250_v19  ;;  %v288_v32 = vunpack.c.l.bf16 %v463_v24  ;;  %v290_v33 = vunpack.c.l.bf16 %v464_v25  ;;  %v248_v35 = vadd.f32 %v238_v27, %v222_v21  ;;  %v451_v52 = vld [vmem:[%s570_s21 + $0x28] sm:$0xff]  ;;  %v456_v58 = vld [vmem:[%s570_s21 + $0x50] sm:$0xff]  ;;  %v457_v63 = vld [vmem:[%s570_s21 + $0x58] sm:$0xff] }
  0x16   : > { %v246_v31 = vadd.f32 %v236_v22, %v220_v20  ;;  %v277_v34 = vadd.f32 %v267_v14, %v251_v26  ;;  %v221_v36 = vunpack.c.h.bf16 %v213_v10  ;;  %v223_v37 = vunpack.c.h.bf16 %v214_v11  ;;  %v461_v0 = vld [vmem:[%s570_s21 + $0x78] sm:$0xff]  ;;  %v462_v1 = vld [vmem:[%s570_s21 + $0x80] sm:$0xff] }
  0x17   : > { %v302_v38 = vadd.f32 %v292_v12, %v276_v30  ;;  %v237_v40 = vunpack.c.h.bf16 %v453_v16  ;;  %v239_v41 = vunpack.c.h.bf16 %v454_v17  ;;  %v274_v43 = vadd.f32 %v264_v29, %v248_v35  ;;  %v304_v35 = vld [vmem:[%s611_s1] sm:$0xf] }
  0x18   : > { %v272_v39 = vadd.f32 %v262_v28, %v246_v31  ;;  %v303_v42 = vadd.f32 %v293_v15, %v277_v34  ;;  %v263_v44 = vunpack.c.h.bf16 %v458_v18  ;;  %v265_v45 = vunpack.c.h.bf16 %v459_v23 }
  0x19   : > { %v309_v47 = vpack.c.bf16 %v302_v38, %v302_v38  ;;  %v247_v49 = vadd.f32 %v237_v40, %v221_v36  ;;  %v249_v50 = vadd.f32 %v239_v41, %v223_v37  ;;  %v300_v54 = vadd.f32 %v290_v33, %v274_v43 }
  0x1a   : > { %v298_v48 = vadd.f32 %v288_v32, %v272_v39  ;;  %v310_v53 = vpack.c.bf16 %v303_v42, %v303_v42  ;;  %v289_v55 = vunpack.c.h.bf16 %v463_v24  ;;  %v291_v56 = vunpack.c.h.bf16 %v464_v25 }
  0x1b   : > { %v323_v59 = vsel %vm321_vm0, %v309_v47, 0  ;;  %v273_v60 = vadd.f32 %v263_v44, %v247_v49  ;;  %v275_v61 = vadd.f32 %v265_v45, %v249_v50  ;;  %v216_v62 = vunpack.c.l.bf16 %v211_v46 }
  0x1c   : > { %333 = vmatpush.bf16.msra.mxu0 %v323_v59  ;;  %v326_v2 = vsel %vm321_vm0, %v310_v53, 0  ;;  %v307_v3 = vpack.c.bf16 %v300_v54, %v298_v48  ;;  %v218_v4 = vunpack.c.l.bf16 %v212_v51  ;;  %v232_v5 = vunpack.c.l.bf16 %v451_v52 }
  0x1d   : > { %346 = vmatpush.bf16.msra.mxu1 %v326_v2  ;;  %v299_v6 = vadd.f32 %v289_v55, %v273_v60  ;;  %v301_v7 = vadd.f32 %v291_v56, %v275_v61  ;;  %v234_v8 = vunpack.c.l.bf16 %v452_v57  ;;  %v258_v9 = vunpack.c.l.bf16 %v456_v58 }
  0x1e   : > { %v242_v10 = vadd.f32 %v232_v5, %v216_v62  ;;  %v260_v11 = vunpack.c.l.bf16 %v457_v63  ;;  %v284_v12 = vunpack.c.l.bf16 %v461_v0  ;;  %v286_v13 = vunpack.c.l.bf16 %v462_v1 }
  0x1f   : > { %v308_v14 = vpack.c.bf16 %v301_v7, %v299_v6  ;;  %v244_v15 = vadd.f32 %v234_v8, %v218_v4  ;;  %v217_v16 = vunpack.c.h.bf16 %v211_v46  ;;  %v219_v17 = vunpack.c.h.bf16 %v212_v51 }
  0x20   : > { %334 = vmatpush.bf16.msra.mxu0 %v307_v3  ;;  %v268_v18 = vadd.f32 %v258_v9, %v242_v10  ;;  %v233_v19 = vunpack.c.h.bf16 %v451_v52  ;;  %v235_v20 = vunpack.c.h.bf16 %v452_v57  ;;  %v259_v21 = vunpack.c.h.bf16 %v456_v58 }
  0x21   : > { %347 = vmatpush.bf16.msra.mxu1 %v308_v14  ;;  %v270_v22 = vadd.f32 %v260_v11, %v244_v15  ;;  %v261_v23 = vunpack.c.h.bf16 %v457_v63  ;;  %v285_v24 = vunpack.c.h.bf16 %v461_v0  ;;  %v287_v28 = vunpack.c.h.bf16 %v462_v1 }
  0x22   : > { %v294_v25 = vadd.f32 %v284_v12, %v268_v18  ;;  %v243_v26 = vadd.f32 %v233_v19, %v217_v16  ;;  %v245_v27 = vadd.f32 %v235_v20, %v219_v17 }
  0x23   : > { %v296_v29 = vadd.f32 %v286_v13, %v270_v22 }
  0x24   : > { %v269_v30 = vadd.f32 %v259_v21, %v243_v26  ;;  %v271_v31 = vadd.f32 %v261_v23, %v245_v27 }
  0x25   : > { %v305_v32 = vpack.c.bf16 %v296_v29, %v294_v25 }
  0x26   : > { %v295_v33 = vadd.f32 %v285_v24, %v269_v30  ;;  %v297_v34 = vadd.f32 %v287_v28, %v271_v31 }
  0x27   : > { %335 = vmatpush.bf16.msra.mxu0 %v305_v32 }
  0x28   : > { %v306_v36 = vpack.c.bf16 %v297_v34, %v295_v33 }
  0x2a   : > { %348 = vmatpush.bf16.msra.mxu1 %v306_v36  ;;  %466 = vmatmul.msk.bf16.vlgmr.msra.gmra.mxu0 %vm317_vm1, %v304_v35 }
  0x2d   : > { %467 = vmatmul.msk.bf16.vlgmr.msra.gmra.mxu1 %vm317_vm1, %v304_v35 }
  0x80   : > { %v315_v37 = vpop.permute.xlu0 %314 }
  0xa7   : > { %v337_v38 = vpop.f32.mrf.mxu0 }
  0xa8   : > { %v338_v39 = vadd.f32 %v337_v38, %v315_v37 }
  0xaa   : > { %354 = vst [vmem:[%s208_s27] sm:$0xff] %v338_v39  ;;  %v350_v40 = vpop.f32.mrf.mxu1 }
  0xab   : > { %v351_v41 = vadd.f32 %v350_v40, %v315_v37 }
  0xad   : > { %355 = vst [vmem:[%s208_s27 + $0x8] sm:$0xff] %v351_v41 }
  0xaf   : > { %v339_v42 = vpop.f32.mrf.mxu0 }
  0xb2   : > { %v352_v43 = vpop.f32.mrf.mxu1 }
  0xb3 PF: > { %s13_s14 = sadd.s32 1, %s520_s14   ;;  %s614_s12 = smov %s516_s13 }
  0xb4   : > { %p10_p5 = scmp.ge.s32.totalorder %s13_s14, 4   ;;  %s615_s13 = smov %s617_s15 }
  0xb6   :  { %12 = sbr.rel (!%p10_p5) target bundleno = 2 (0x2), region = 65 }

</bundles_post_ra>
